<compile_context>
chip_gen: v7x
topology: tpu7x:2x2x1
jax: 0.10.0
libtpu: 0.0.40
codegen_flags: <defaults>
</compile_context>

<pallas_src>
import functools

import jax
import jax.numpy as jnp
from jax.experimental import pallas as pl
from jax.experimental.pallas import tpu as pltpu

_LANE = 128
_SUBLANE = 8
# Total per-step VMEM budget: double-buffered input block(s) + output block.
_VMEM_BUDGET_BYTES = 8 * 1024 * 1024
# Expose at least this many grid steps on large problems (v7x dual-TC +
# pipelining), but never shrink a block below this many rows to do so.
_MIN_GRID_STEPS = 8
_MIN_ROWS_FOR_SPLIT = 512


def _round_up(x: int, mult: int) -> int:
    return ((x + mult - 1) // mult) * mult


def _fused_kernel_stacked(emb_ref, out_ref, *, num_modalities: int):
    """emb_ref: (M, T, C) dense block; out_ref: (T, C) dense block."""
    acc = emb_ref[0]
    for m in range(1, num_modalities):
        acc = acc * emb_ref[m]
    out_ref[...] = acc


def _fused_kernel_multi(*refs):
    """refs = (emb_ref_0, ..., emb_ref_{M-1}, out_ref), all (T, C) blocks."""
    *emb_refs, out_ref = refs
    acc = emb_refs[0][...]
    for r in emb_refs[1:]:
        acc = acc * r[...]
    out_ref[...] = acc


def _pick_rows(num_rows: int, num_modalities: int, num_cols: int, itemsize: int):
    """Choose the row-tile T (multiple of 8, or the full row count)."""
    cols_pad = _round_up(num_cols, _LANE)
    # Double-buffered M input row-blocks + 1 output row-block, sublane/lane padded.
    bytes_per_row = 2 * (num_modalities + 1) * cols_pad * itemsize
    t = max(_SUBLANE,
            (_VMEM_BUDGET_BYTES // bytes_per_row) // _SUBLANE * _SUBLANE)
    if num_rows >= _MIN_GRID_STEPS * _MIN_ROWS_FOR_SPLIT:
        # Large problem: make sure there are >= ~8 grid steps for v7x / pipelining.
        t = min(t, _round_up(pl.cdiv(num_rows, _MIN_GRID_STEPS), _SUBLANE))
    if t >= num_rows:
        return num_rows, 1  # single full block; block dims == array dims (legal)
    return t, pl.cdiv(num_rows, t)


def multiplicative_fusion(embeddings):
    """Element-wise product over the modality axis.

    Accepts either a stacked (M, B, L) array or a list/tuple of M arrays of
    shape (B, L) (the list form avoids any stacking copy).  Returns a (B, L)
    array, or None if there are no modalities (matching the PyTorch early
    return).
    """
    is_seq = isinstance(embeddings, (list, tuple))
    num_modalities = len(embeddings) if is_seq else embeddings.shape[0]
    if num_modalities == 0:
        # TODO(synk): returning None matches PyTorch but is not jit-traceable.
        return None

    if is_seq:
        batch, latent = embeddings[0].shape
        dtype = embeddings[0].dtype
    else:
        _, batch, latent = embeddings.shape
        dtype = embeddings.dtype

    n = batch * latent
    itemsize = jnp.dtype(dtype).itemsize

    # Dense layout: (rows, cols) with cols on the 128-lane axis when the fused
    # size is 128-aligned (free contiguous reshape); otherwise keep (B, L) and
    # use a full-lane-dim block (last block dim == full array dim is legal).
    if n % _LANE == 0:
        rows, cols = n // _LANE, _LANE
    else:
        rows, cols = batch, latent

    t_rows, steps = _pick_rows(rows, num_modalities, cols, itemsize)
    grid = (steps,)

    out_shape = jax.ShapeDtypeStruct((rows, cols), dtype)
    out_spec = pl.BlockSpec((t_rows, cols), lambda i: (i, 0))

    if is_seq:
        ins = tuple(e.reshape(rows, cols) for e in embeddings)
        in_specs = [pl.BlockSpec((t_rows, cols), lambda i: (i, 0))
                    for _ in range(num_modalities)]
        kernel = _fused_kernel_multi
    else:
        ins = (embeddings.reshape(num_modalities, rows, cols),)
        in_specs = [pl.BlockSpec((num_modalities, t_rows, cols),
                                 lambda i: (0, i, 0))]
        kernel = functools.partial(_fused_kernel_stacked,
                                   num_modalities=num_modalities)

    out = pl.pallas_call(
        kernel,
        out_shape=out_shape,
        grid_spec=pltpu.PrefetchScalarGridSpec(
            num_scalar_prefetch=0,
            grid=grid,
            in_specs=in_specs,
            out_specs=out_spec,
        ),
        compiler_params=pltpu.CompilerParams(
            # Row-tile axis is fully independent -> shard across TCs (v7x).
            dimension_semantics=("parallel",),
        ),
    )(*ins)

    return out.reshape(batch, latent)


if __name__ == "__main__":
    latent_size = 32
    num_modalities = 3
    batch = 2

    key = jax.random.PRNGKey(0)
    embeddings = jax.random.normal(
        key, (num_modalities, batch, latent_size), dtype=jnp.float32
    )

    out = jax.block_until_ready(multiplicative_fusion(embeddings))
    ref = jnp.prod(embeddings, axis=0)
    assert out.shape == (batch, latent_size)
    assert jnp.allclose(out, ref, rtol=1e-6, atol=1e-6)

    # List-of-embeddings API (matches the PyTorch List[Tensor] signature).
    out_list = jax.block_until_ready(
        multiplicative_fusion([embeddings[m] for m in range(num_modalities)])
    )
    assert jnp.allclose(out_list, ref, rtol=1e-6, atol=1e-6)

    # Larger case: 128-aligned fused size -> dense (rows,128) retile, two grid
    # steps with a masked ragged tail.
    emb_a = jax.random.normal(jax.random.PRNGKey(1), (3, 40, 8192), jnp.float32)
    out_a = jax.block_until_ready(multiplicative_fusion(emb_a))
    assert out_a.shape == (40, 8192)
    assert jnp.allclose(out_a, jnp.prod(emb_a, axis=0), rtol=1e-6, atol=1e-6)

    # Larger case: non-128-aligned last dim -> full-lane-dim blocks, no padding.
    emb_b = jax.random.normal(jax.random.PRNGKey(2), (4, 7, 5000), jnp.float32)
    out_b = jax.block_until_ready(multiplicative_fusion(emb_b))
    assert out_b.shape == (7, 5000)
    assert jnp.allclose(out_b, jnp.prod(emb_b, axis=0), rtol=1e-6, atol=1e-6)

    print("KERNEL_OK")
</pallas_src>

<mosaic_0001>
module attributes {stable_mosaic.version = 11 : i64} {
  func.func @_fused_kernel_stacked(%arg0: i32, %arg1: memref<3x2x32xf32, #tpu.memory_space<vmem>>, %arg2: memref<2x32xf32, #tpu.memory_space<vmem>>) attributes {dimension_semantics = [#tpu.dimension_semantics<parallel>], iteration_bounds = array<i64: 1>, scalar_prefetch = 0 : i64, scratch_operands = 0 : i64, tpu.core_type = #tpu.core_type<tc>, window_params = [{transform_indices = @transform_0, window_bounds = array<i64: 3, 2, 32>}, {transform_indices = @transform_1, window_bounds = array<i64: 2, 32>}]} {
    %c0 = arith.constant 0 : index
    %c0_0 = arith.constant 0 : index
    %c0_1 = arith.constant 0 : index
    %0 = vector.load %arg1[%c0, %c0_0, %c0_1] : memref<3x2x32xf32, #tpu.memory_space<vmem>>, vector<1x2x32xf32>
    %1 = vector.shape_cast %0 : vector<1x2x32xf32> to vector<2x32xf32>
    %c1 = arith.constant 1 : index
    %c0_2 = arith.constant 0 : index
    %c0_3 = arith.constant 0 : index
    %2 = vector.load %arg1[%c1, %c0_2, %c0_3] : memref<3x2x32xf32, #tpu.memory_space<vmem>>, vector<1x2x32xf32>
    %3 = vector.shape_cast %2 : vector<1x2x32xf32> to vector<2x32xf32>
    %4 = arith.mulf %1, %3 : vector<2x32xf32>
    %c2 = arith.constant 2 : index
    %c0_4 = arith.constant 0 : index
    %c0_5 = arith.constant 0 : index
    %5 = vector.load %arg1[%c2, %c0_4, %c0_5] : memref<3x2x32xf32, #tpu.memory_space<vmem>>, vector<1x2x32xf32>
    %6 = vector.shape_cast %5 : vector<1x2x32xf32> to vector<2x32xf32>
    %7 = arith.mulf %4, %6 : vector<2x32xf32>
    %c0_6 = arith.constant 0 : index
    %c0_7 = arith.constant 0 : index
    %8 = vector.load %arg2[%c0_6, %c0_7] : memref<2x32xf32, #tpu.memory_space<vmem>>, vector<2x32xf32>
    tpu.vector_store %arg2[%c0_6, %c0_7], %7 {strides = array<i32>} : memref<2x32xf32, #tpu.memory_space<vmem>>, vector<2x32xf32>,
    return
  }
  func.func @transform_0(%arg0: i32) -> (i32, i32, i32) {
    %c0_i32 = arith.constant 0 : i32
    %c0_i32_0 = arith.constant 0 : i32
    %c0_i32_1 = arith.constant 0 : i32
    return %c0_i32, %arg0, %c0_i32_0 : i32, i32, i32
  }
  func.func @transform_1(%arg0: i32) -> (i32, i32) {
    %c0_i32 = arith.constant 0 : i32
    %c0_i32_0 = arith.constant 0 : i32
    return %arg0, %c0_i32 : i32, i32
  }
}

</mosaic_0001>

<bundles_post_ra>
// kernel: tpu_custom_call.1
= control target key start
LH: loop header
LB: loop body
LE: loop exit
PB: predicated region body
PF: predicated region fallthrough
CT: control target
= control target key end

     0   :  { %6 = vsyncpa [#allocation3], 0  ;;  %s137_s0 = inlined_call_operand.hbm [shape: f32[3,2,32], index: 0, kind: input, shape index: {}]   ;;  %s138_s1 = inlined_call_operand.hbm [shape: f32[2,32], index: 1, kind: output, shape index: {}]  }
   0x1   :  { %7 = vsyncpa [#allocation4], 0  ;;  %s99_s6 = smov [#allocation2]   ;;  %s51_s10 = scalar_lea.hbm %s137_s0, 96 }
   0x2   :  { %s13_s7 = sshll.u32 %s99_s6, 4  ;;  %p52_p0 = scmp.ne.s32.totalorder %s137_s0, %s51_s10  ;;  %s14_s7 = int_to_ptr.vmem [resolvable:$true] %s13_s7 }
   0x3   :  { %p55_p1 = scmp.lt.u32.totalorder %s51_s10, %s137_s0 }
   0x5   :  { %p57_p2 = pnand %p55_p1, %p52_p0 }
   0x7   :  { %60 = shalt.err (!%p57_p2)
}
   0x8   :  { %s61_s15 = scalar_lea.vmem %s14_s7, 96  ;;  %p66_p4 = scmp.lt.s32.totalorder %s14_s7, %s14_s7 }
   0x9   :  { %p62_p3 = scmp.ne.s32.totalorder %s14_s7, %s61_s15  ;;  %p67_p5 = scmp.lt.s32.totalorder %s61_s15, %s61_s15 }
   0xb   :  { %p68_p6 = por %p67_p5, %p66_p4 }
   0xd   :  { %p69_p7 = pnand %p68_p6, %p62_p3 }
   0xf   :  { %72 = shalt.err (!%p69_p7)
}
  0x10   :  { %s100_s16 = smov 32   ;;  %s101_s17 = smov 2  }
  0x11   :  { %19 = dma.hbm_to_vmem [thread:$0]  %s137_s0, 96, %s14_s7, [#allocation3], %s100_s16, %s100_s16, %s101_s17  }
  0x12   :  { %95 = dma.done.wait [#allocation3], 96  }
  0x13   :  { %96 = vsyncadd [#allocation3], 4294967200  ;;  %s102_s20 = smov [#allocation5]   ;;  %v23_v0 = vld [vmem:[#allocation2] sm:$0x3]  ;;  %vm30_vm0 = vcmask 254976  }
  0x14   :  { %s38_s21 = sshll.u32 %s102_s20, 4  ;;  %v25_v1 = vld [vmem:[#allocation2 + $0x2] sm:$0x3]  ;;  %v28_v2 = vld [vmem:[#allocation2 + $0x4] sm:$0x3]  ;;  %s39_s21 = int_to_ptr.vmem [resolvable:$true] %s38_s21 }
  0x15   :  { %v26_v3 = vmul.f32 %v25_v1, %v23_v0  ;;  %s73_s22 = scalar_lea.vmem %s39_s21, 32  ;;  %p78_p9 = scmp.lt.s32.totalorder %s39_s21, %s39_s21 }
  0x16   :  { %p74_p8 = scmp.ne.s32.totalorder %s39_s21, %s73_s22  ;;  %p79_p10 = scmp.lt.s32.totalorder %s73_s22, %s73_s22 }
  0x17   :  { %v29_v4 = vmul.f32 %v28_v2, %v26_v3 }
  0x18   :  { %p80_p11 = por %p79_p10, %p78_p9 }
  0x19   :  { %31 = vst.msk [vmem:[#allocation5] sm:$0x3] %vm30_vm0, %v29_v4 }
  0x1a   :  { %p81_p12 = pnand %p80_p11, %p74_p8 }
  0x1c   :  { %84 = shalt.err (!%p81_p12)
}
  0x1d   :  { %s85_s24 = scalar_lea.hbm %s138_s1, 32 }
  0x1e   :  { %p86_p13 = scmp.ne.s32.totalorder %s138_s1, %s85_s24  ;;  %p89_p0 = scmp.lt.u32.totalorder %s85_s24, %s138_s1 }
  0x20   :  { %p91_p1 = pnand %p89_p0, %p86_p13 }
  0x22   :  { %94 = shalt.err (!%p91_p1)
}
  0x23   :  { %41 = dma.vmem_to_hbm [thread:$0]  %s39_s21, 32, %s138_s1, [#allocation4]  }
  0x24   :  { %97 = dma.done.wait [#allocation4], 32  }
  0x25   :  { %98 = vsyncadd [#allocation4], 4294967264 }
  0x26   :  { %45 = vsyncpa [#allocation3], 1 }
  0x27   :  { %46 = vsyncpa [#allocation4], 1 }

</bundles_post_ra>
